<compile_context>
chip_gen: v7x
topology: tpu7x:2x2x1
jax: 0.10.0
libtpu: 0.0.40
codegen_flags: <defaults>
</compile_context>

<pallas_src>
import functools

import jax
import jax.numpy as jnp
from jax.experimental import pallas as pl
from jax.experimental.pallas import tpu as pltpu

TILE = 256       # row / contraction tile (multiple of 256 for v6e/v7x MXU)
LANE = 128       # lane-dense padding of feature dims


def _round_up(x, m):
    return ((x + m - 1) // m) * m


def _pad2d(a, rows, cols, dtype):
    a = a.astype(dtype)
    return jnp.pad(a, ((0, rows - a.shape[0]), (0, cols - a.shape[1])))


# ----------------------------- Pallas kernels --------------------------------
def _project_kernel(x_ref, w_ref, o_ref):
    # XW row-tile = X_rowtile @ W   (bf16 operands, f32 MXU accumulate)
    o_ref[...] = jnp.dot(
        x_ref[...], w_ref[...], preferred_element_type=jnp.float32
    ).astype(o_ref.dtype)


def _project(x, w, *, tm=TILE):
    """Row-tiled X @ W -> bf16 [N_pad, C_pad]."""
    n_pad, f_pad = x.shape
    c_pad = w.shape[1]
    return pl.pallas_call(
        _project_kernel,
        out_shape=jax.ShapeDtypeStruct((n_pad, c_pad), jnp.bfloat16),
        grid=(n_pad // tm,),
        in_specs=[
            pl.BlockSpec((tm, f_pad), lambda i: (i, 0)),
            pl.BlockSpec((f_pad, c_pad), lambda i: (0, 0)),
        ],
        out_specs=pl.BlockSpec((tm, c_pad), lambda i: (i, 0)),
        compiler_params=pltpu.CompilerParams(
            dimension_semantics=("parallel",)),
        cost_estimate=pl.CostEstimate(
            flops=2 * n_pad * f_pad * c_pad,
            transcendentals=0,
            bytes_accessed=(n_pad * f_pad + f_pad * c_pad + n_pad * c_pad) * 2),
    )(x, w)


def _aggregate_kernel(a_ref, xw_ref, b_ref, o_ref, acc_ref, *, apply_relu):
    k = pl.program_id(1)

    @pl.when(k == 0)
    def _():
        acc_ref[...] = jnp.zeros_like(acc_ref)

    # A_hat tile @ XW tile  (bf16 operands, f32 accumulate on the MXU).
    acc_ref[...] += jnp.dot(
        a_ref[...], xw_ref[...], preferred_element_type=jnp.float32)

    @pl.when(k == pl.num_programs(1) - 1)
    def _():
        out = acc_ref[...] + b_ref[...]        # bias only once, in the epilogue
        if apply_relu:
            out = jnp.maximum(out, 0.0)
        o_ref[...] = out.astype(o_ref.dtype)


def _aggregate(a_hat, xw, bias2d, *, apply_relu, out_dtype, tm=TILE, tk=TILE):
    """Tiled A_hat @ XW + b (optional fused relu) with an f32 VMEM accumulator."""
    n_pad = a_hat.shape[0]
    c_pad = xw.shape[1]
    grid = (n_pad // tm, n_pad // tk)
    kernel = functools.partial(_aggregate_kernel, apply_relu=apply_relu)
    bytes_accessed = (
        n_pad * n_pad * 2                        # A_hat (bf16), each tile once
        + grid[0] * n_pad * c_pad * 2            # XW re-streamed per row tile
        + n_pad * c_pad * jnp.dtype(out_dtype).itemsize)
    return pl.pallas_call(
        kernel,
        out_shape=jax.ShapeDtypeStruct((n_pad, c_pad), out_dtype),
        grid=grid,
        in_specs=[
            pl.BlockSpec((tm, tk), lambda i, k: (i, k)),
            pl.BlockSpec((tk, c_pad), lambda i, k: (k, 0)),
            pl.BlockSpec((1, c_pad), lambda i, k: (0, 0)),
        ],
        out_specs=pl.BlockSpec((tm, c_pad), lambda i, k: (i, 0)),
        scratch_shapes=[pltpu.VMEM((tm, c_pad), jnp.float32)],
        compiler_params=pltpu.CompilerParams(
            dimension_semantics=("parallel", "arbitrary")),
        cost_estimate=pl.CostEstimate(
            flops=2 * n_pad * n_pad * c_pad,
            transcendentals=0,
            bytes_accessed=bytes_accessed),
    )(a_hat, xw, bias2d)


# ------------------------------- glue (JAX) -----------------------------------
def build_normalized_adjacency(edge_index, num_nodes):
    """Dense A_hat = D^{-1/2} (A + I) D^{-1/2}, matching GCNConv defaults.

    Duplicate (src, dst) edges scatter-add (weight == multiplicity), matching
    PyG's scatter; self-loops are added only for nodes that do not already
    have one (add_remaining_self_loops with fill_value = 1).
    """
    src, dst = edge_index[0], edge_index[1]
    a = jnp.zeros((num_nodes, num_nodes), jnp.float32)
    # message flows src -> dst:  A[dst, src] += 1
    a = a.at[dst, src].add(1.0)
    idx = jnp.arange(num_nodes)
    diag = a[idx, idx]
    a = a.at[idx, idx].set(jnp.where(diag == 0.0, 1.0, diag))
    deg = jnp.sum(a, axis=1)
    dinv = jnp.where(deg > 0, 1.0 / jnp.sqrt(deg), 0.0)
    return dinv[:, None] * a * dinv[None, :]


def gcn_forward(x, edge_index, params):
    n, f = x.shape
    hidden = params["w1"].shape[1]
    classes = params["w2"].shape[1]

    n_pad = _round_up(max(n, TILE), TILE)
    f_pad = _round_up(max(f, LANE), LANE)
    h_pad = _round_up(max(hidden, LANE), LANE)
    c_pad = _round_up(max(classes, LANE), LANE)

    # TODO(synk): block-sparse A_hat tiling (PrefetchScalarGridSpec with
    # nonzero-block offsets) for real graph sizes; dense N x N tiles here.
    a_hat = build_normalized_adjacency(edge_index, n)
    a_pad = _pad2d(a_hat, n_pad, n_pad, jnp.bfloat16)

    x_pad = _pad2d(x, n_pad, f_pad, jnp.bfloat16)
    w1_pad = _pad2d(params["w1"], f_pad, h_pad, jnp.bfloat16)
    w2_pad = _pad2d(params["w2"], h_pad, c_pad, jnp.bfloat16)
    b1_pad = _pad2d(params["b1"].reshape(1, -1), 1, h_pad, jnp.float32)
    b2_pad = _pad2d(params["b2"].reshape(1, -1), 1, c_pad, jnp.float32)

    # Layer 1: h = relu(A_hat @ (X @ W1) + b1)
    xw1 = _project(x_pad, w1_pad)
    h = _aggregate(a_pad, xw1, b1_pad, apply_relu=True, out_dtype=jnp.bfloat16)

    # F.dropout(p=0.5, training=False) -> identity at inference.
    # TODO(synk): training-mode dropout (pltpu.prng_random_bits) not wired in.

    # Layer 2: out = A_hat @ (h @ W2) + b2
    xw2 = _project(h, w2_pad)
    out = _aggregate(a_pad, xw2, b2_pad, apply_relu=False,
                     out_dtype=jnp.float32)
    return out[:n, :classes]


def init_params(key, num_features, hidden_channels, num_classes):
    k1, k2 = jax.random.split(key)
    # Glorot-uniform style init (deterministic), zero biases — GCNConv shapes.
    def glorot(k, fan_in, fan_out):
        lim = jnp.sqrt(6.0 / (fan_in + fan_out))
        return jax.random.uniform(k, (fan_in, fan_out), jnp.float32, -lim, lim)
    return {
        "w1": glorot(k1, num_features, hidden_channels),
        "b1": jnp.zeros((hidden_channels,), jnp.float32),
        "w2": glorot(k2, hidden_channels, num_classes),
        "b2": jnp.zeros((num_classes,), jnp.float32),
    }


if __name__ == "__main__":
    key = jax.random.PRNGKey(0)
    num_nodes = 64
    num_features = 16
    hidden_channels = 32
    num_classes = 8
    num_edges = 256

    kx, ke, kp = jax.random.split(key, 3)
    x = jax.random.normal(kx, (num_nodes, num_features), jnp.float32)
    edge_index = jax.random.randint(ke, (2, num_edges), 0, num_nodes, jnp.int32)
    params = init_params(kp, num_features, hidden_channels, num_classes)

    out = jax.jit(gcn_forward)(x, edge_index, params)
    jax.block_until_ready(out)
    assert out.shape == (num_nodes, num_classes)
    print("KERNEL_OK")
</pallas_src>

<mosaic_0001>
module attributes {stable_mosaic.version = 11 : i64} {
  func.func private @main(%arg0: i32) attributes {dimension_semantics = [#tpu.dimension_semantics<core_parallel>], iteration_bounds = array<i64: 2>, tpu.core_type = #tpu.core_type<sc_scalar_subcore>, window_params = []} {
    return
  }
}

module attributes {stable_mosaic.version = 11 : i64} {
  func.func private @main(%arg0: i32) attributes {dimension_semantics = [#tpu.dimension_semantics<core_parallel>], iteration_bounds = array<i64: 2>, tpu.core_type = #tpu.core_type<sc_scalar_subcore>, window_params = []} {
    return
  }
}

module attributes {stable_mosaic.version = 11 : i64} {
  func.func @_project_kernel(%arg0: i32, %arg1: memref<256x128xbf16, #tpu.memory_space<vmem>>, %arg2: memref<128x128xbf16, #tpu.memory_space<vmem>>, %arg3: memref<256x128xbf16, #tpu.memory_space<vmem>>) attributes {dimension_semantics = [#tpu.dimension_semantics<parallel>], iteration_bounds = array<i64: 1>, scalar_prefetch = 0 : i64, scratch_operands = 0 : i64, tpu.core_type = #tpu.core_type<tc>, window_params = [{transform_indices = @transform_0, window_bounds = array<i64: 256, 128>}, {pipeline_mode = #tpu.pipeline_mode<synchronous>, transform_indices = @transform_1, window_bounds = array<i64: 128, 128>}, {transform_indices = @transform_2, window_bounds = array<i64: 256, 128>}]} {
    %c0 = arith.constant 0 : index
    %c0_0 = arith.constant 0 : index
    %0 = vector.load %arg1[%c0, %c0_0] : memref<256x128xbf16, #tpu.memory_space<vmem>>, vector<256x128xbf16>
    %c0_1 = arith.constant 0 : index
    %c0_2 = arith.constant 0 : index
    %1 = vector.load %arg2[%c0_1, %c0_2] : memref<128x128xbf16, #tpu.memory_space<vmem>>, vector<128x128xbf16>
    %cst = arith.constant dense<0.000000e+00> : vector<256x128xf32>
    %2 = tpu.matmul %0, %1, %cst {dimension_numbers = #tpu.dot_dimension_numbers<[1], [0], [0], [1], [0, 0, 1, 1], [], []>} : vector<256x128xbf16>, vector<128x128xbf16>, vector<256x128xf32> -> vector<256x128xf32>
    %3 = arith.truncf %2 : vector<256x128xf32> to vector<256x128xbf16>
    %c0_3 = arith.constant 0 : index
    %c0_4 = arith.constant 0 : index
    %4 = vector.load %arg3[%c0_3, %c0_4] : memref<256x128xbf16, #tpu.memory_space<vmem>>, vector<256x128xbf16>
    tpu.vector_store %arg3[%c0_3, %c0_4], %3 {strides = array<i32>} : memref<256x128xbf16, #tpu.memory_space<vmem>>, vector<256x128xbf16>,
    return
  }
  func.func @transform_0(%arg0: i32) -> (i32, i32) {
    %c0_i32 = arith.constant 0 : i32
    %c0_i32_0 = arith.constant 0 : i32
    return %arg0, %c0_i32 : i32, i32
  }
  func.func @transform_1(%arg0: i32) -> (i32, i32) {
    %c0_i32 = arith.constant 0 : i32
    %c0_i32_0 = arith.constant 0 : i32
    %c0_i32_1 = arith.constant 0 : i32
    return %c0_i32, %c0_i32_0 : i32, i32
  }
  func.func @transform_2(%arg0: i32) -> (i32, i32) {
    %c0_i32 = arith.constant 0 : i32
    %c0_i32_0 = arith.constant 0 : i32
    return %arg0, %c0_i32 : i32, i32
  }
}

module attributes {stable_mosaic.version = 11 : i64} {
  func.func @_aggregate_kernel(%arg0: i32, %arg1: i32, %arg2: memref<256x256xbf16, #tpu.memory_space<vmem>>, %arg3: memref<256x128xbf16, #tpu.memory_space<vmem>>, %arg4: memref<1x128xf32, #tpu.memory_space<vmem>>, %arg5: memref<256x128xf32, #tpu.memory_space<vmem>>, %arg6: memref<256x128xf32, #tpu.memory_space<vmem>>) attributes {dimension_semantics = [#tpu.dimension_semantics<parallel>, #tpu.dimension_semantics<arbitrary>], iteration_bounds = array<i64: 1, 1>, scalar_prefetch = 0 : i64, scratch_operands = 1 : i64, tpu.core_type = #tpu.core_type<tc>, window_params = [{transform_indices = @transform_0, window_bounds = array<i64: 256, 256>}, {transform_indices = @transform_1, window_bounds = array<i64: 256, 128>}, {pipeline_mode = #tpu.pipeline_mode<synchronous>, transform_indices = @transform_2, window_bounds = array<i64: 1, 128>}, {transform_indices = @transform_3, window_bounds = array<i64: 256, 128>}]} {
    %c0_i32 = arith.constant 0 : i32
    %0 = arith.cmpi eq, %arg1, %c0_i32 : i32
    %1 = arith.extui %0 : i1 to i32
    %c0_i32_0 = arith.constant 0 : i32
    %2 = arith.cmpi ne, %1, %c0_i32_0 : i32
    scf.if %2 {
      %cst_10 = arith.constant 0.000000e+00 : f32
      %12 = vector.broadcast %cst_10 : f32 to vector<256x128xf32>
      %c0_11 = arith.constant 0 : index
      %c0_12 = arith.constant 0 : index
      %13 = vector.load %arg6[%c0_11, %c0_12] : memref<256x128xf32, #tpu.memory_space<vmem>>, vector<256x128xf32>
      tpu.vector_store %arg6[%c0_11, %c0_12], %12 {strides = array<i32>} : memref<256x128xf32, #tpu.memory_space<vmem>>, vector<256x128xf32>,
    } else {
    }
    %c0 = arith.constant 0 : index
    %c0_1 = arith.constant 0 : index
    %3 = vector.load %arg6[%c0, %c0_1] : memref<256x128xf32, #tpu.memory_space<vmem>>, vector<256x128xf32>
    %c0_2 = arith.constant 0 : index
    %c0_3 = arith.constant 0 : index
    %4 = vector.load %arg2[%c0_2, %c0_3] : memref<256x256xbf16, #tpu.memory_space<vmem>>, vector<256x256xbf16>
    %c0_4 = arith.constant 0 : index
    %c0_5 = arith.constant 0 : index
    %5 = vector.load %arg3[%c0_4, %c0_5] : memref<256x128xbf16, #tpu.memory_space<vmem>>, vector<256x128xbf16>
    %cst = arith.constant dense<0.000000e+00> : vector<256x128xf32>
    %6 = tpu.matmul %4, %5, %cst {dimension_numbers = #tpu.dot_dimension_numbers<[1], [0], [0], [1], [0, 0, 1, 1], [], []>} : vector<256x256xbf16>, vector<256x128xbf16>, vector<256x128xf32> -> vector<256x128xf32>
    %7 = arith.addf %3, %6 : vector<256x128xf32>
    %c0_6 = arith.constant 0 : index
    %c0_7 = arith.constant 0 : index
    %8 = vector.load %arg6[%c0_6, %c0_7] : memref<256x128xf32, #tpu.memory_space<vmem>>, vector<256x128xf32>
    tpu.vector_store %arg6[%c0_6, %c0_7], %7 {strides = array<i32>} : memref<256x128xf32, #tpu.memory_space<vmem>>, vector<256x128xf32>,
    %c0_i32_8 = arith.constant 0 : i32
    %9 = arith.cmpi eq, %arg1, %c0_i32_8 : i32
    %10 = arith.extui %9 : i1 to i32
    %c0_i32_9 = arith.constant 0 : i32
    %11 = arith.cmpi ne, %10, %c0_i32_9 : i32
    scf.if %11 {
      %c0_10 = arith.constant 0 : index
      %c0_11 = arith.constant 0 : index
      %12 = vector.load %arg6[%c0_10, %c0_11] : memref<256x128xf32, #tpu.memory_space<vmem>>, vector<256x128xf32>
      %c0_12 = arith.constant 0 : index
      %c0_13 = arith.constant 0 : index
      %13 = vector.load %arg4[%c0_12, %c0_13] : memref<1x128xf32, #tpu.memory_space<vmem>>, vector<1x128xf32>
      %14 = vector.broadcast %13 : vector<1x128xf32> to vector<256x128xf32>
      %15 = arith.addf %12, %14 : vector<256x128xf32>
      %c0_14 = arith.constant 0 : index
      %c0_15 = arith.constant 0 : index
      %16 = vector.load %arg5[%c0_14, %c0_15] : memref<256x128xf32, #tpu.memory_space<vmem>>, vector<256x128xf32>
      tpu.vector_store %arg5[%c0_14, %c0_15], %15 {strides = array<i32>} : memref<256x128xf32, #tpu.memory_space<vmem>>, vector<256x128xf32>,
    } else {
    }
    return
  }
  func.func @transform_0(%arg0: i32, %arg1: i32) -> (i32, i32) {
    %c0_i32 = arith.constant 0 : i32
    return %arg0, %arg1 : i32, i32
  }
  func.func @transform_1(%arg0: i32, %arg1: i32) -> (i32, i32) {
    %c0_i32 = arith.constant 0 : i32
    %c0_i32_0 = arith.constant 0 : i32
    return %arg1, %c0_i32 : i32, i32
  }
  func.func @transform_2(%arg0: i32, %arg1: i32) -> (i32, i32) {
    %c0_i32 = arith.constant 0 : i32
    %c0_i32_0 = arith.constant 0 : i32
    %c0_i32_1 = arith.constant 0 : i32
    return %c0_i32, %c0_i32_0 : i32, i32
  }
  func.func @transform_3(%arg0: i32, %arg1: i32) -> (i32, i32) {
    %c0_i32 = arith.constant 0 : i32
    %c0_i32_0 = arith.constant 0 : i32
    return %arg0, %c0_i32 : i32, i32
  }
}

module attributes {stable_mosaic.version = 11 : i64} {
  func.func @_aggregate_kernel(%arg0: i32, %arg1: i32, %arg2: memref<256x256xbf16, #tpu.memory_space<vmem>>, %arg3: memref<256x128xbf16, #tpu.memory_space<vmem>>, %arg4: memref<1x128xf32, #tpu.memory_space<vmem>>, %arg5: memref<256x128xbf16, #tpu.memory_space<vmem>>, %arg6: memref<256x128xf32, #tpu.memory_space<vmem>>) attributes {dimension_semantics = [#tpu.dimension_semantics<parallel>, #tpu.dimension_semantics<arbitrary>], iteration_bounds = array<i64: 1, 1>, scalar_prefetch = 0 : i64, scratch_operands = 1 : i64, tpu.core_type = #tpu.core_type<tc>, window_params = [{transform_indices = @transform_0, window_bounds = array<i64: 256, 256>}, {transform_indices = @transform_1, window_bounds = array<i64: 256, 128>}, {pipeline_mode = #tpu.pipeline_mode<synchronous>, transform_indices = @transform_2, window_bounds = array<i64: 1, 128>}, {transform_indices = @transform_3, window_bounds = array<i64: 256, 128>}]} {
    %c0_i32 = arith.constant 0 : i32
    %0 = arith.cmpi eq, %arg1, %c0_i32 : i32
    %1 = arith.extui %0 : i1 to i32
    %c0_i32_0 = arith.constant 0 : i32
    %2 = arith.cmpi ne, %1, %c0_i32_0 : i32
    scf.if %2 {
      %cst_10 = arith.constant 0.000000e+00 : f32
      %12 = vector.broadcast %cst_10 : f32 to vector<256x128xf32>
      %c0_11 = arith.constant 0 : index
      %c0_12 = arith.constant 0 : index
      %13 = vector.load %arg6[%c0_11, %c0_12] : memref<256x128xf32, #tpu.memory_space<vmem>>, vector<256x128xf32>
      tpu.vector_store %arg6[%c0_11, %c0_12], %12 {strides = array<i32>} : memref<256x128xf32, #tpu.memory_space<vmem>>, vector<256x128xf32>,
    } else {
    }
    %c0 = arith.constant 0 : index
    %c0_1 = arith.constant 0 : index
    %3 = vector.load %arg6[%c0, %c0_1] : memref<256x128xf32, #tpu.memory_space<vmem>>, vector<256x128xf32>
    %c0_2 = arith.constant 0 : index
    %c0_3 = arith.constant 0 : index
    %4 = vector.load %arg2[%c0_2, %c0_3] : memref<256x256xbf16, #tpu.memory_space<vmem>>, vector<256x256xbf16>
    %c0_4 = arith.constant 0 : index
    %c0_5 = arith.constant 0 : index
    %5 = vector.load %arg3[%c0_4, %c0_5] : memref<256x128xbf16, #tpu.memory_space<vmem>>, vector<256x128xbf16>
    %cst = arith.constant dense<0.000000e+00> : vector<256x128xf32>
    %6 = tpu.matmul %4, %5, %cst {dimension_numbers = #tpu.dot_dimension_numbers<[1], [0], [0], [1], [0, 0, 1, 1], [], []>} : vector<256x256xbf16>, vector<256x128xbf16>, vector<256x128xf32> -> vector<256x128xf32>
    %7 = arith.addf %3, %6 : vector<256x128xf32>
    %c0_6 = arith.constant 0 : index
    %c0_7 = arith.constant 0 : index
    %8 = vector.load %arg6[%c0_6, %c0_7] : memref<256x128xf32, #tpu.memory_space<vmem>>, vector<256x128xf32>
    tpu.vector_store %arg6[%c0_6, %c0_7], %7 {strides = array<i32>} : memref<256x128xf32, #tpu.memory_space<vmem>>, vector<256x128xf32>,
    %c0_i32_8 = arith.constant 0 : i32
    %9 = arith.cmpi eq, %arg1, %c0_i32_8 : i32
    %10 = arith.extui %9 : i1 to i32
    %c0_i32_9 = arith.constant 0 : i32
    %11 = arith.cmpi ne, %10, %c0_i32_9 : i32
    scf.if %11 {
      %c0_10 = arith.constant 0 : index
      %c0_11 = arith.constant 0 : index
      %12 = vector.load %arg6[%c0_10, %c0_11] : memref<256x128xf32, #tpu.memory_space<vmem>>, vector<256x128xf32>
      %c0_12 = arith.constant 0 : index
      %c0_13 = arith.constant 0 : index
      %13 = vector.load %arg4[%c0_12, %c0_13] : memref<1x128xf32, #tpu.memory_space<vmem>>, vector<1x128xf32>
      %14 = vector.broadcast %13 : vector<1x128xf32> to vector<256x128xf32>
      %15 = arith.addf %12, %14 : vector<256x128xf32>
      %cst_14 = arith.constant 0.000000e+00 : f32
      %16 = vector.broadcast %cst_14 : f32 to vector<256x128xf32>
      %17 = arith.maximumf %15, %16 : vector<256x128xf32>
      %18 = arith.truncf %17 : vector<256x128xf32> to vector<256x128xbf16>
      %c0_15 = arith.constant 0 : index
      %c0_16 = arith.constant 0 : index
      %19 = vector.load %arg5[%c0_15, %c0_16] : memref<256x128xbf16, #tpu.memory_space<vmem>>, vector<256x128xbf16>
      tpu.vector_store %arg5[%c0_15, %c0_16], %18 {strides = array<i32>} : memref<256x128xbf16, #tpu.memory_space<vmem>>, vector<256x128xbf16>,
    } else {
    }
    return
  }
  func.func @transform_0(%arg0: i32, %arg1: i32) -> (i32, i32) {
    %c0_i32 = arith.constant 0 : i32
    return %arg0, %arg1 : i32, i32
  }
  func.func @transform_1(%arg0: i32, %arg1: i32) -> (i32, i32) {
    %c0_i32 = arith.constant 0 : i32
    %c0_i32_0 = arith.constant 0 : i32
    return %arg1, %c0_i32 : i32, i32
  }
  func.func @transform_2(%arg0: i32, %arg1: i32) -> (i32, i32) {
    %c0_i32 = arith.constant 0 : i32
    %c0_i32_0 = arith.constant 0 : i32
    %c0_i32_1 = arith.constant 0 : i32
    return %c0_i32, %c0_i32_0 : i32, i32
  }
  func.func @transform_3(%arg0: i32, %arg1: i32) -> (i32, i32) {
    %c0_i32 = arith.constant 0 : i32
    %c0_i32_0 = arith.constant 0 : i32
    return %arg0, %c0_i32 : i32, i32
  }
}

</mosaic_0001>

<bundles_post_ra>
// kernel: gcn_forward.4
= control target key start
LH: loop header
LB: loop body
LE: loop exit
PB: predicated region body
PF: predicated region fallthrough
CT: control target
= control target key end

     0   :  { %s959_s1 = inlined_call_operand.vmem [shape: bf16[128,128], index: 1, kind: input, shape index: {}]   ;;  %s960_s0 = inlined_call_operand.vmem [shape: bf16[256,128], index: 0, kind: input, shape index: {}]   ;;  %s961_s2 = inlined_call_operand.vmem [shape: bf16[256,128], index: 2, kind: output, shape index: {}]  }
   0x1   :  { %v800_v0 = vld [vmem:[%s959_s1] sm:$0xff]   ;;  %v801_v1 = vld [vmem:[%s959_s1 + $0x8] sm:$0xff]   ;;  %v802_v2 = vld [vmem:[%s959_s1 + $0x10] sm:$0xff]  }
   0x2   :  { %736 = vmatprep.subr.bf16.mxu0 %v800_v0  ;;  %784 = vmatprep.subr.bf16.mxu1 %v800_v0  ;;  %v803_v3 = vld [vmem:[%s959_s1 + $0x18] sm:$0xff]   ;;  %v808_v4 = vld [vmem:[%s960_s0] sm:$0xff]   ;;  %v805_v7 = vld [vmem:[%s959_s1 + $0x28] sm:$0xff]  }
   0x3   :  { %737 = vmatpush3.bf16.msra.mxu0 %v800_v0  ;;  %792 = vmatpush3.bf16.msra.mxu1 %v800_v0  ;;  %v809_v5 = vld [vmem:[%s960_s0 + $0x40] sm:$0xff]   ;;  %v806_v8 = vld [vmem:[%s959_s1 + $0x30] sm:$0xff]   ;;  %v807_v9 = vld [vmem:[%s959_s1 + $0x38] sm:$0xff]  }
   0x4   :  { %738 = vmatprep.subr.bf16.mxu0 %v801_v1  ;;  %785 = vmatprep.subr.bf16.mxu1 %v801_v1  ;;  %v804_v6 = vld [vmem:[%s959_s1 + $0x20] sm:$0xff]   ;;  %v810_v10 = vld [vmem:[%s960_s0 + $0x8] sm:$0xff]   ;;  %v812_v12 = vld [vmem:[%s960_s0 + $0x10] sm:$0xff]  }
   0x5   :  { %752 = vmatprep.mubr.bf16.mxu0 %v808_v4  ;;  %768 = vmatprep.mubr.bf16.mxu1 %v809_v5  ;;  %v811_v11 = vld [vmem:[%s960_s0 + $0x48] sm:$0xff]   ;;  %v813_v13 = vld [vmem:[%s960_s0 + $0x50] sm:$0xff]   ;;  %v814_v14 = vld [vmem:[%s960_s0 + $0x18] sm:$0xff]  }
   0x6   :  { %v815_v15 = vld [vmem:[%s960_s0 + $0x58] sm:$0xff]   ;;  %v816_v16 = vld [vmem:[%s960_s0 + $0x20] sm:$0xff]   ;;  %v818_v18 = vld [vmem:[%s960_s0 + $0x28] sm:$0xff]  }
   0x7   :  { %739 = vmatpush3.bf16.msra.mxu0 %v801_v1  ;;  %793 = vmatpush3.bf16.msra.mxu1 %v801_v1  ;;  %v817_v17 = vld [vmem:[%s960_s0 + $0x60] sm:$0xff]   ;;  %v819_v19 = vld [vmem:[%s960_s0 + $0x68] sm:$0xff]   ;;  %v820_v20 = vld [vmem:[%s960_s0 + $0x30] sm:$0xff]  }
   0x8   :  { %740 = vmatprep.subr.bf16.mxu0 %v802_v2  ;;  %786 = vmatprep.subr.bf16.mxu1 %v802_v2  ;;  %v821_v21 = vld [vmem:[%s960_s0 + $0x70] sm:$0xff]   ;;  %v822_v22 = vld [vmem:[%s960_s0 + $0x38] sm:$0xff]  }
   0x9   :  { %v823_v23 = vld [vmem:[%s960_s0 + $0x78] sm:$0xff]  }
   0xb   :  { %741 = vmatpush3.bf16.msra.mxu0 %v802_v2  ;;  %794 = vmatpush3.bf16.msra.mxu1 %v802_v2 }
   0xc   :  { %742 = vmatprep.subr.bf16.mxu0 %v803_v3  ;;  %787 = vmatprep.subr.bf16.mxu1 %v803_v3 }
   0xf   :  { %743 = vmatpush3.bf16.msra.mxu0 %v803_v3  ;;  %795 = vmatpush3.bf16.msra.mxu1 %v803_v3 }
  0x10   :  { %744 = vmatprep.subr.bf16.mxu0 %v804_v6  ;;  %788 = vmatprep.subr.bf16.mxu1 %v804_v6 }
  0x13   :  { %745 = vmatpush3.bf16.msra.mxu0 %v804_v6  ;;  %796 = vmatpush3.bf16.msra.mxu1 %v804_v6 }
  0x14   :  { %746 = vmatprep.subr.bf16.mxu0 %v805_v7  ;;  %789 = vmatprep.subr.bf16.mxu1 %v805_v7 }
  0x17   :  { %747 = vmatpush3.bf16.msra.mxu0 %v805_v7  ;;  %797 = vmatpush3.bf16.msra.mxu1 %v805_v7 }
  0x18   :  { %748 = vmatprep.subr.bf16.mxu0 %v806_v8  ;;  %790 = vmatprep.subr.bf16.mxu1 %v806_v8 }
  0x1b   :  { %749 = vmatpush3.bf16.msra.mxu0 %v806_v8  ;;  %798 = vmatpush3.bf16.msra.mxu1 %v806_v8 }
  0x1c   :  { %750 = vmatprep.subr.bf16.mxu0 %v807_v9  ;;  %791 = vmatprep.subr.bf16.mxu1 %v807_v9 }
  0x1f   :  { %751 = vmatpush3.bf16.msra.mxu0 %v807_v9  ;;  %799 = vmatpush3.bf16.msra.mxu1 %v807_v9 }
  0x22   :  { %753 = vmatmul.mubr.bf16.vlgmr.msra.gmra.mrb[0].mxu0 %v810_v10  ;;  %769 = vmatmul.mubr.bf16.vlgmr.msra.gmra.mrb[0].mxu1 %v811_v11 }
  0x23   :  { %756 = vmatprep.mubr.bf16.mxu0 %v812_v12  ;;  %772 = vmatprep.mubr.bf16.mxu1 %v813_v13 }
  0x2a   :  { %757 = vmatmul.mubr.bf16.gmra.mrb[4].mxu0 %v814_v14  ;;  %773 = vmatmul.mubr.bf16.gmra.mrb[4].mxu1 %v815_v15 }
  0x2b   :  { %760 = vmatprep.mubr.bf16.mxu0 %v816_v16  ;;  %776 = vmatprep.mubr.bf16.mxu1 %v817_v17 }
  0x32   :  { %761 = vmatmul.mubr.bf16.gmra.mrb[8].mxu0 %v818_v18  ;;  %777 = vmatmul.mubr.bf16.gmra.mrb[8].mxu1 %v819_v19 }
  0x33   :  { %764 = vmatprep.mubr.bf16.mxu0 %v820_v20  ;;  %780 = vmatprep.mubr.bf16.mxu1 %v821_v21 }
  0x3a   :  { %765 = vmatmul.mubr.bf16.gmra.mrb[12].mxu0 %v822_v22  ;;  %781 = vmatmul.mubr.bf16.gmra.mrb[12].mxu1 %v823_v23 }
  0xf5   :  { %v754_v24 = vpop.f32.mrb[0].mxu0  ;;  %v770_v25 = vpop.f32.mrb[0].mxu1 }
  0xf6   :  { %v238_v26 = vpop.f32.mrb[1].mxu0  ;;  %v302_v27 = vpop.f32.mrb[1].mxu1 }
  0xf7   :  { %v755_v28 = vpop.f32.mrb[2].mxu0  ;;  %v771_v29 = vpop.f32.mrb[2].mxu1 }
  0xf8   :  { %v625_v30 = vpack.c.bf16 %v755_v28, %v754_v24  ;;  %v665_v31 = vpack.c.bf16 %v771_v29, %v770_v25  ;;  %v241_v32 = vpop.f32.mrb[3].mxu0  ;;  %v305_v33 = vpop.f32.mrb[3].mxu1 }
  0xf9   :  { %v620_v34 = vpack.c.bf16 %v241_v32, %v238_v26  ;;  %v660_v35 = vpack.c.bf16 %v305_v33, %v302_v27 }
  0xfa   :  { %697 = vst [vmem:[%s961_s2 + $0x8] sm:$0xff] %v625_v30   ;;  %705 = vst [vmem:[%s961_s2 + $0x48] sm:$0xff] %v665_v31  }
  0xfb   :  { %621 = vst [vmem:[%s961_s2] sm:$0xff] %v620_v34   ;;  %704 = vst [vmem:[%s961_s2 + $0x40] sm:$0xff] %v660_v35  }
  0xfd   :  { %v758_v36 = vpop.f32.mrb[4].mxu0  ;;  %v774_v37 = vpop.f32.mrb[4].mxu1 }
  0xfe   :  { %v254_v38 = vpop.f32.mrb[5].mxu0  ;;  %v318_v39 = vpop.f32.mrb[5].mxu1 }
  0xff   :  { %v759_v40 = vpop.f32.mrb[6].mxu0  ;;  %v775_v41 = vpop.f32.mrb[6].mxu1 }
 0x100   :  { %v635_v42 = vpack.c.bf16 %v759_v40, %v758_v36  ;;  %v675_v43 = vpack.c.bf16 %v775_v41, %v774_v37  ;;  %v257_v44 = vpop.f32.mrb[7].mxu0  ;;  %v321_v45 = vpop.f32.mrb[7].mxu1 }
 0x101   :  { %v630_v46 = vpack.c.bf16 %v257_v44, %v254_v38  ;;  %v670_v47 = vpack.c.bf16 %v321_v45, %v318_v39 }
 0x102   :  { %699 = vst [vmem:[%s961_s2 + $0x18] sm:$0xff] %v635_v42   ;;  %707 = vst [vmem:[%s961_s2 + $0x58] sm:$0xff] %v675_v43  }
 0x103   :  { %698 = vst [vmem:[%s961_s2 + $0x10] sm:$0xff] %v630_v46   ;;  %706 = vst [vmem:[%s961_s2 + $0x50] sm:$0xff] %v670_v47  }
 0x105   :  { %v762_v48 = vpop.f32.mrb[8].mxu0  ;;  %v778_v49 = vpop.f32.mrb[8].mxu1 }
 0x106   :  { %v270_v50 = vpop.f32.mrb[9].mxu0  ;;  %v334_v51 = vpop.f32.mrb[9].mxu1 }
 0x107   :  { %v763_v52 = vpop.f32.mrb[10].mxu0  ;;  %v779_v53 = vpop.f32.mrb[10].mxu1 }
 0x108   :  { %v645_v54 = vpack.c.bf16 %v763_v52, %v762_v48  ;;  %v685_v55 = vpack.c.bf16 %v779_v53, %v778_v49  ;;  %v273_v56 = vpop.f32.mrb[11].mxu0  ;;  %v337_v57 = vpop.f32.mrb[11].mxu1 }
 0x109   :  { %v640_v58 = vpack.c.bf16 %v273_v56, %v270_v50  ;;  %v680_v59 = vpack.c.bf16 %v337_v57, %v334_v51 }
 0x10a   :  { %701 = vst [vmem:[%s961_s2 + $0x28] sm:$0xff] %v645_v54   ;;  %709 = vst [vmem:[%s961_s2 + $0x68] sm:$0xff] %v685_v55  }
 0x10b   :  { %700 = vst [vmem:[%s961_s2 + $0x20] sm:$0xff] %v640_v58   ;;  %708 = vst [vmem:[%s961_s2 + $0x60] sm:$0xff] %v680_v59  }
 0x10d   :  { %v766_v60 = vpop.f32.mrb[12].mxu0  ;;  %v782_v61 = vpop.f32.mrb[12].mxu1 }
 0x10e   :  { %v286_v62 = vpop.f32.mrb[13].mxu0  ;;  %v350_v63 = vpop.f32.mrb[13].mxu1 }
 0x10f   :  { %v767_v0 = vpop.f32.mrb[14].mxu0  ;;  %v783_v1 = vpop.f32.mrb[14].mxu1 }
 0x110   :  { %v655_v2 = vpack.c.bf16 %v767_v0, %v766_v60  ;;  %v695_v3 = vpack.c.bf16 %v783_v1, %v782_v61  ;;  %v289_v4 = vpop.f32.mrb[15].mxu0  ;;  %v353_v5 = vpop.f32.mrb[15].mxu1 }
 0x111   :  { %v650_v6 = vpack.c.bf16 %v289_v4, %v286_v62  ;;  %v690_v7 = vpack.c.bf16 %v353_v5, %v350_v63 }
 0x112   :  { %703 = vst [vmem:[%s961_s2 + $0x38] sm:$0xff] %v655_v2   ;;  %711 = vst [vmem:[%s961_s2 + $0x78] sm:$0xff] %v695_v3  }
 0x113   :  { %702 = vst [vmem:[%s961_s2 + $0x30] sm:$0xff] %v650_v6   ;;  %710 = vst [vmem:[%s961_s2 + $0x70] sm:$0xff] %v690_v7  }

// kernel: gcn_forward.7
= control target key start
LH: loop header
LB: loop body
LE: loop exit
PB: predicated region body
PF: predicated region fallthrough
CT: control target
= control target key end

     0   :  { %s1276_s1 = inlined_call_operand.vmem [shape: bf16[256,128], index: 1, kind: input, shape index: {}]   ;;  %s1277_s0 = inlined_call_operand.vmem [shape: bf16[256,256], index: 0, kind: input, shape index: {}]   ;;  %s1278_s2 = inlined_call_operand.vmem [shape: f32[1,128], index: 2, kind: input, shape index: {}]   ;;  %s1279_s3 = inlined_call_operand.vmem [shape: f32[256,128], index: 3, kind: output, shape index: {}]  }
   0x1   :  { %v915_v0 = vld [vmem:[%s1276_s1 + $0x40] sm:$0xff]   ;;  %v917_v2 = vld [vmem:[%s1276_s1 + $0x48] sm:$0xff]   ;;  %v919_v4 = vld [vmem:[%s1276_s1 + $0x50] sm:$0xff]  }
   0x2   :  { %v916_v1 = vld [vmem:[%s1276_s1] sm:$0xff]   ;;  %787 = vmatprep.subr.bf16.mxu0 %v915_v0  ;;  %899 = vmatprep.subr.bf16.mxu1 %v915_v0  ;;  %v918_v3 = vld [vmem:[%s1276_s1 + $0x8] sm:$0xff]   ;;  %v920_v5 = vld [vmem:[%s1276_s1 + $0x10] sm:$0xff]  }
   0x3   :  { %788 = vmatpush3.bf16.msra.mxu0 %v916_v1  ;;  %907 = vmatpush3.bf16.msra.mxu1 %v916_v1  ;;  %v921_v6 = vld [vmem:[%s1276_s1 + $0x58] sm:$0xff]   ;;  %v923_v8 = vld [vmem:[%s1276_s1 + $0x60] sm:$0xff]   ;;  %v925_v10 = vld [vmem:[%s1276_s1 + $0x68] sm:$0xff]  }
   0x4   :  { %789 = vmatprep.subr.bf16.mxu0 %v917_v2  ;;  %900 = vmatprep.subr.bf16.mxu1 %v917_v2  ;;  %v922_v7 = vld [vmem:[%s1276_s1 + $0x18] sm:$0xff]   ;;  %v924_v9 = vld [vmem:[%s1276_s1 + $0x20] sm:$0xff]   ;;  %v926_v13 = vld [vmem:[%s1276_s1 + $0x28] sm:$0xff]  }
   0x5   :  { %v933_v11 = vld [vmem:[%s1277_s0 + $0x4] ss:$8 sps:$4 sm:$0xff]   ;;  %v927_v14 = vld [vmem:[%s1276_s1 + $0x70] sm:$0xff]   ;;  %v929_v16 = vld [vmem:[%s1276_s1 + $0x78] sm:$0xff]  }
   0x6   :  { %v936_v12 = vld [vmem:[%s1277_s0 + $0x84] ss:$8 sps:$4 sm:$0xff]   ;;  %435 = vmatprep.mubr.bf16.mxu0 %v933_v11  ;;  %v928_v15 = vld [vmem:[%s1276_s1 + $0x30] sm:$0xff]   ;;  %v930_v17 = vld [vmem:[%s1276_s1 + $0x38] sm:$0xff]  }
   0x7   :  { %790 = vmatpush3.bf16.msra.mxu0 %v918_v3  ;;  %908 = vmatpush3.bf16.msra.mxu1 %v918_v3  ;;  %v931_v18 = vld [vmem:[%s1277_s0] ss:$8 sps:$4 sm:$0xff]   ;;  %v937_v20 = vld [vmem:[%s1277_s0 + $0x14] ss:$8 sps:$4 sm:$0xff]   ;;  %v941_v22 = vld [vmem:[%s1277_s0 + $0x10] ss:$8 sps:$4 sm:$0xff]  }
   0x8   :  { %791 = vmatprep.subr.bf16.mxu0 %v919_v4  ;;  %901 = vmatprep.subr.bf16.mxu1 %v919_v4  ;;  %v934_v19 = vld [vmem:[%s1277_s0 + $0x80] ss:$8 sps:$4 sm:$0xff]   ;;  %v939_v21 = vld [vmem:[%s1277_s0 + $0x94] ss:$8 sps:$4 sm:$0xff]   ;;  %v942_v23 = vld [vmem:[%s1277_s0 + $0x90] ss:$8 sps:$4 sm:$0xff]  }
   0x9   :  { %499 = vmatprep.mubr.bf16.mxu1 %v936_v12  ;;  %v943_v24 = vld [vmem:[%s1277_s0 + $0x24] ss:$8 sps:$4 sm:$0xff]   ;;  %v947_v26 = vld [vmem:[%s1277_s0 + $0x20] ss:$8 sps:$4 sm:$0xff]   ;;  %v949_v28 = vld [vmem:[%s1277_s0 + $0x34] ss:$8 sps:$4 sm:$0xff]  }
   0xa   :  { %v945_v25 = vld [vmem:[%s1277_s0 + $0xa4] ss:$8 sps:$4 sm:$0xff]   ;;  %v948_v27 = vld [vmem:[%s1277_s0 + $0xa0] ss:$8 sps:$4 sm:$0xff]   ;;  %v951_v29 = vld [vmem:[%s1277_s0 + $0xb4] ss:$8 sps:$4 sm:$0xff]  }
   0xb   :  { %792 = vmatpush3.bf16.msra.mxu0 %v920_v5  ;;  %909 = vmatpush3.bf16.msra.mxu1 %v920_v5  ;;  %v953_v30 = vld [vmem:[%s1277_s0 + $0x30] ss:$8 sps:$4 sm:$0xff]   ;;  %v955_v32 = vld [vmem:[%s1277_s0 + $0x44] ss:$8 sps:$4 sm:$0xff]   ;;  %v959_v34 = vld [vmem:[%s1277_s0 + $0x40] ss:$8 sps:$4 sm:$0xff]  }
   0xc   :  { %793 = vmatprep.subr.bf16.mxu0 %v921_v6  ;;  %902 = vmatprep.subr.bf16.mxu1 %v921_v6  ;;  %v954_v31 = vld [vmem:[%s1277_s0 + $0xb0] ss:$8 sps:$4 sm:$0xff]   ;;  %v957_v33 = vld [vmem:[%s1277_s0 + $0xc4] ss:$8 sps:$4 sm:$0xff]   ;;  %v960_v35 = vld [vmem:[%s1277_s0 + $0xc0] ss:$8 sps:$4 sm:$0xff]  }
   0xd   :  { %v961_v36 = vld [vmem:[%s1277_s0 + $0x54] ss:$8 sps:$4 sm:$0xff]   ;;  %v965_v38 = vld [vmem:[%s1277_s0 + $0x50] ss:$8 sps:$4 sm:$0xff]   ;;  %v967_v40 = vld [vmem:[%s1277_s0 + $0x64] ss:$8 sps:$4 sm:$0xff]  }
   0xe   :  { %v963_v37 = vld [vmem:[%s1277_s0 + $0xd4] ss:$8 sps:$4 sm:$0xff]   ;;  %v966_v39 = vld [vmem:[%s1277_s0 + $0xd0] ss:$8 sps:$4 sm:$0xff]   ;;  %v969_v41 = vld [vmem:[%s1277_s0 + $0xe4] ss:$8 sps:$4 sm:$0xff]  }
   0xf   :  { %794 = vmatpush3.bf16.msra.mxu0 %v922_v7  ;;  %910 = vmatpush3.bf16.msra.mxu1 %v922_v7  ;;  %v971_v42 = vld [vmem:[%s1277_s0 + $0x60] ss:$8 sps:$4 sm:$0xff]   ;;  %v973_v44 = vld [vmem:[%s1277_s0 + $0x74] ss:$8 sps:$4 sm:$0xff]   ;;  %v977_v46 = vld [vmem:[%s1277_s0 + $0x70] ss:$8 sps:$4 sm:$0xff]  }
  0x10   :  { %795 = vmatprep.subr.bf16.mxu0 %v923_v8  ;;  %903 = vmatprep.subr.bf16.mxu1 %v923_v8  ;;  %v972_v43 = vld [vmem:[%s1277_s0 + $0xe0] ss:$8 sps:$4 sm:$0xff]   ;;  %v975_v45 = vld [vmem:[%s1277_s0 + $0xf4] ss:$8 sps:$4 sm:$0xff]   ;;  %v978_v47 = vld [vmem:[%s1277_s0 + $0xf0] ss:$8 sps:$4 sm:$0xff]  }
  0x11   :  { %v1146_v51 = vld [vmem:[%s1278_s2] ss:$0 sm:$0xff] }
  0x13   :  { %796 = vmatpush3.bf16.msra.mxu0 %v924_v9  ;;  %911 = vmatpush3.bf16.msra.mxu1 %v924_v9 }
  0x14   :  { %797 = vmatprep.subr.bf16.mxu0 %v925_v10  ;;  %904 = vmatprep.subr.bf16.mxu1 %v925_v10 }
  0x17   :  { %798 = vmatpush3.bf16.msra.mxu0 %v926_v13  ;;  %912 = vmatpush3.bf16.msra.mxu1 %v926_v13 }
  0x18   :  { %799 = vmatprep.subr.bf16.mxu0 %v927_v14  ;;  %905 = vmatprep.subr.bf16.mxu1 %v927_v14 }
  0x1b   :  { %800 = vmatpush3.bf16.msra.mxu0 %v928_v15  ;;  %913 = vmatpush3.bf16.msra.mxu1 %v928_v15 }
  0x1c   :  { %801 = vmatprep.subr.bf16.mxu0 %v929_v16  ;;  %906 = vmatprep.subr.bf16.mxu1 %v929_v16 }
  0x1f   :  { %802 = vmatpush3.bf16.msra.mxu0 %v930_v17  ;;  %914 = vmatpush3.bf16.msra.mxu1 %v930_v17 }
  0x22   :  { %436 = vmatmul.mubr.bf16.vlgmr.msra.gmra.mrb[0].mxu0 %v931_v18  ;;  %500 = vmatmul.mubr.bf16.vlgmr.msra.gmra.mrb[0].mxu1 %v934_v19 }
  0x23   :  { %443 = vmatprep.mubr.bf16.mxu0 %v937_v20  ;;  %507 = vmatprep.mubr.bf16.mxu1 %v939_v21 }
  0x2a   :  { %444 = vmatmul.mubr.bf16.gmra.mrb[4].mxu0 %v941_v22  ;;  %508 = vmatmul.mubr.bf16.gmra.mrb[4].mxu1 %v942_v23 }
  0x2b   :  { %451 = vmatprep.mubr.bf16.mxu0 %v943_v24  ;;  %515 = vmatprep.mubr.bf16.mxu1 %v945_v25 }
  0x32   :  { %452 = vmatmul.mubr.bf16.gmra.mrb[8].mxu0 %v947_v26  ;;  %516 = vmatmul.mubr.bf16.gmra.mrb[8].mxu1 %v948_v27 }
  0x33   :  { %459 = vmatprep.mubr.bf16.mxu0 %v949_v28  ;;  %523 = vmatprep.mubr.bf16.mxu1 %v951_v29 }
  0x3a   :  { %460 = vmatmul.mubr.bf16.gmra.mrb[12].mxu0 %v953_v30  ;;  %524 = vmatmul.mubr.bf16.gmra.mrb[12].mxu1 %v954_v31 }
  0x3b   :  { %467 = vmatprep.mubr.bf16.mxu0 %v955_v32  ;;  %531 = vmatprep.mubr.bf16.mxu1 %v957_v33 }
  0x42   :  { %468 = vmatmul.mubr.bf16.gmra.mrb[16].mxu0 %v959_v34  ;;  %532 = vmatmul.mubr.bf16.gmra.mrb[16].mxu1 %v960_v35 }
  0x43   :  { %475 = vmatprep.mubr.bf16.mxu0 %v961_v36  ;;  %539 = vmatprep.mubr.bf16.mxu1 %v963_v37 }
  0x4a   :  { %476 = vmatmul.mubr.bf16.gmra.mrb[20].mxu0 %v965_v38  ;;  %540 = vmatmul.mubr.bf16.gmra.mrb[20].mxu1 %v966_v39 }
  0x4b   :  { %483 = vmatprep.mubr.bf16.mxu0 %v967_v40  ;;  %547 = vmatprep.mubr.bf16.mxu1 %v969_v41 }
  0x52   :  { %484 = vmatmul.mubr.bf16.gmra.mrb[24].mxu0 %v971_v42  ;;  %548 = vmatmul.mubr.bf16.gmra.mrb[24].mxu1 %v972_v43 }
  0x53   :  { %491 = vmatprep.mubr.bf16.mxu0 %v973_v44  ;;  %555 = vmatprep.mubr.bf16.mxu1 %v975_v45 }
  0x5a   :  { %492 = vmatmul.mubr.bf16.gmra.mrb[28].mxu0 %v977_v46  ;;  %556 = vmatmul.mubr.bf16.gmra.mrb[28].mxu1 %v978_v47 }
  0xf5   :  { %v803_v48 = vpop.f32.mrb[0].mxu0  ;;  %v851_v49 = vpop.f32.mrb[0].mxu1 }
  0xf6   :  { %v804_v50 = vpop.f32.mrb[1].mxu0  ;;  %v852_v52 = vpop.f32.mrb[1].mxu1 }
  0xf7   :  { %v805_v53 = vadd.f32 %v804_v50, %v803_v48  ;;  %v853_v54 = vadd.f32 %v852_v52, %v851_v49  ;;  %v806_v55 = vpop.f32.mrb[2].mxu0  ;;  %v854_v56 = vpop.f32.mrb[2].mxu1 }
  0xf8   :  { %v807_v57 = vpop.f32.mrb[3].mxu0  ;;  %v855_v58 = vpop.f32.mrb[3].mxu1 }
  0xf9   :  { %v670_v59 = vadd.f32 %v805_v53, %v1146_v51  ;;  %v686_v60 = vadd.f32 %v853_v54, %v1146_v51  ;;  %v808_v61 = vadd.f32 %v807_v57, %v806_v55  ;;  %v856_v62 = vadd.f32 %v855_v58, %v854_v56 }
  0xfb   :  { %702 = vst [vmem:[%s1279_s3] sm:$0xff] %v670_v59  ;;  %718 = vst [vmem:[%s1279_s3 + $0x80] sm:$0xff] %v686_v60  ;;  %v671_v63 = vadd.f32 %v808_v61, %v1146_v51  ;;  %v687_v0 = vadd.f32 %v856_v62, %v1146_v51 }
  0xfd   :  { %703 = vst [vmem:[%s1279_s3 + $0x8] sm:$0xff] %v671_v63  ;;  %719 = vst [vmem:[%s1279_s3 + $0x88] sm:$0xff] %v687_v0  ;;  %v809_v1 = vpop.f32.mrb[4].mxu0  ;;  %v857_v2 = vpop.f32.mrb[4].mxu1 }
  0xfe   :  { %v810_v3 = vpop.f32.mrb[5].mxu0  ;;  %v858_v4 = vpop.f32.mrb[5].mxu1 }
  0xff   :  { %v811_v5 = vadd.f32 %v810_v3, %v809_v1  ;;  %v859_v6 = vadd.f32 %v858_v4, %v857_v2  ;;  %v812_v7 = vpop.f32.mrb[6].mxu0  ;;  %v860_v8 = vpop.f32.mrb[6].mxu1 }
 0x100   :  { %v813_v9 = vpop.f32.mrb[7].mxu0  ;;  %v861_v10 = vpop.f32.mrb[7].mxu1 }
 0x101   :  { %v672_v11 = vadd.f32 %v811_v5, %v1146_v51  ;;  %v688_v12 = vadd.f32 %v859_v6, %v1146_v51  ;;  %v814_v13 = vadd.f32 %v813_v9, %v812_v7  ;;  %v862_v14 = vadd.f32 %v861_v10, %v860_v8 }
 0x103   :  { %704 = vst [vmem:[%s1279_s3 + $0x10] sm:$0xff] %v672_v11  ;;  %720 = vst [vmem:[%s1279_s3 + $0x90] sm:$0xff] %v688_v12  ;;  %v673_v15 = vadd.f32 %v814_v13, %v1146_v51  ;;  %v689_v16 = vadd.f32 %v862_v14, %v1146_v51 }
 0x105   :  { %705 = vst [vmem:[%s1279_s3 + $0x18] sm:$0xff] %v673_v15  ;;  %721 = vst [vmem:[%s1279_s3 + $0x98] sm:$0xff] %v689_v16  ;;  %v815_v17 = vpop.f32.mrb[8].mxu0  ;;  %v863_v18 = vpop.f32.mrb[8].mxu1 }
 0x106   :  { %v816_v19 = vpop.f32.mrb[9].mxu0  ;;  %v864_v20 = vpop.f32.mrb[9].mxu1 }
 0x107   :  { %v817_v21 = vadd.f32 %v816_v19, %v815_v17  ;;  %v865_v22 = vadd.f32 %v864_v20, %v863_v18  ;;  %v818_v23 = vpop.f32.mrb[10].mxu0  ;;  %v866_v24 = vpop.f32.mrb[10].mxu1 }
 0x108   :  { %v819_v25 = vpop.f32.mrb[11].mxu0  ;;  %v867_v26 = vpop.f32.mrb[11].mxu1 }
 0x109   :  { %v674_v27 = vadd.f32 %v817_v21, %v1146_v51  ;;  %v690_v28 = vadd.f32 %v865_v22, %v1146_v51  ;;  %v820_v29 = vadd.f32 %v819_v25, %v818_v23  ;;  %v868_v30 = vadd.f32 %v867_v26, %v866_v24 }
 0x10b   :  { %706 = vst [vmem:[%s1279_s3 + $0x20] sm:$0xff] %v674_v27  ;;  %722 = vst [vmem:[%s1279_s3 + $0xa0] sm:$0xff] %v690_v28  ;;  %v675_v31 = vadd.f32 %v820_v29, %v1146_v51  ;;  %v691_v32 = vadd.f32 %v868_v30, %v1146_v51 }
 0x10d   :  { %707 = vst [vmem:[%s1279_s3 + $0x28] sm:$0xff] %v675_v31  ;;  %723 = vst [vmem:[%s1279_s3 + $0xa8] sm:$0xff] %v691_v32  ;;  %v821_v33 = vpop.f32.mrb[12].mxu0  ;;  %v869_v34 = vpop.f32.mrb[12].mxu1 }
 0x10e   :  { %v822_v35 = vpop.f32.mrb[13].mxu0  ;;  %v870_v36 = vpop.f32.mrb[13].mxu1 }
 0x10f   :  { %v823_v37 = vadd.f32 %v822_v35, %v821_v33  ;;  %v871_v38 = vadd.f32 %v870_v36, %v869_v34  ;;  %v824_v39 = vpop.f32.mrb[14].mxu0  ;;  %v872_v40 = vpop.f32.mrb[14].mxu1 }
 0x110   :  { %v825_v41 = vpop.f32.mrb[15].mxu0  ;;  %v873_v42 = vpop.f32.mrb[15].mxu1 }
 0x111   :  { %v676_v43 = vadd.f32 %v823_v37, %v1146_v51  ;;  %v692_v44 = vadd.f32 %v871_v38, %v1146_v51  ;;  %v826_v45 = vadd.f32 %v825_v41, %v824_v39  ;;  %v874_v46 = vadd.f32 %v873_v42, %v872_v40 }
 0x113   :  { %708 = vst [vmem:[%s1279_s3 + $0x30] sm:$0xff] %v676_v43  ;;  %724 = vst [vmem:[%s1279_s3 + $0xb0] sm:$0xff] %v692_v44  ;;  %v677_v47 = vadd.f32 %v826_v45, %v1146_v51  ;;  %v693_v48 = vadd.f32 %v874_v46, %v1146_v51 }
 0x115   :  { %709 = vst [vmem:[%s1279_s3 + $0x38] sm:$0xff] %v677_v47  ;;  %725 = vst [vmem:[%s1279_s3 + $0xb8] sm:$0xff] %v693_v48  ;;  %v827_v49 = vpop.f32.mrb[16].mxu0  ;;  %v875_v50 = vpop.f32.mrb[16].mxu1 }
 0x116   :  { %v828_v52 = vpop.f32.mrb[17].mxu0  ;;  %v876_v53 = vpop.f32.mrb[17].mxu1 }
 0x117   :  { %v829_v54 = vadd.f32 %v828_v52, %v827_v49  ;;  %v877_v55 = vadd.f32 %v876_v53, %v875_v50  ;;  %v830_v56 = vpop.f32.mrb[18].mxu0  ;;  %v878_v57 = vpop.f32.mrb[18].mxu1 }
 0x118   :  { %v831_v58 = vpop.f32.mrb[19].mxu0  ;;  %v879_v59 = vpop.f32.mrb[19].mxu1 }
 0x119   :  { %v678_v60 = vadd.f32 %v829_v54, %v1146_v51  ;;  %v694_v61 = vadd.f32 %v877_v55, %v1146_v51  ;;  %v832_v62 = vadd.f32 %v831_v58, %v830_v56  ;;  %v880_v63 = vadd.f32 %v879_v59, %v878_v57 }
 0x11b   :  { %710 = vst [vmem:[%s1279_s3 + $0x40] sm:$0xff] %v678_v60  ;;  %726 = vst [vmem:[%s1279_s3 + $0xc0] sm:$0xff] %v694_v61  ;;  %v679_v0 = vadd.f32 %v832_v62, %v1146_v51  ;;  %v695_v1 = vadd.f32 %v880_v63, %v1146_v51 }
 0x11d   :  { %711 = vst [vmem:[%s1279_s3 + $0x48] sm:$0xff] %v679_v0  ;;  %727 = vst [vmem:[%s1279_s3 + $0xc8] sm:$0xff] %v695_v1  ;;  %v833_v2 = vpop.f32.mrb[20].mxu0  ;;  %v881_v3 = vpop.f32.mrb[20].mxu1 }
 0x11e   :  { %v834_v4 = vpop.f32.mrb[21].mxu0  ;;  %v882_v5 = vpop.f32.mrb[21].mxu1 }
 0x11f   :  { %v835_v6 = vadd.f32 %v834_v4, %v833_v2  ;;  %v883_v7 = vadd.f32 %v882_v5, %v881_v3  ;;  %v836_v8 = vpop.f32.mrb[22].mxu0  ;;  %v884_v9 = vpop.f32.mrb[22].mxu1 }
 0x120   :  { %v837_v10 = vpop.f32.mrb[23].mxu0  ;;  %v885_v11 = vpop.f32.mrb[23].mxu1 }
 0x121   :  { %v680_v12 = vadd.f32 %v835_v6, %v1146_v51  ;;  %v696_v13 = vadd.f32 %v883_v7, %v1146_v51  ;;  %v838_v14 = vadd.f32 %v837_v10, %v836_v8  ;;  %v886_v15 = vadd.f32 %v885_v11, %v884_v9 }
 0x123   :  { %712 = vst [vmem:[%s1279_s3 + $0x50] sm:$0xff] %v680_v12  ;;  %728 = vst [vmem:[%s1279_s3 + $0xd0] sm:$0xff] %v696_v13  ;;  %v681_v16 = vadd.f32 %v838_v14, %v1146_v51  ;;  %v697_v17 = vadd.f32 %v886_v15, %v1146_v51 }
 0x125   :  { %713 = vst [vmem:[%s1279_s3 + $0x58] sm:$0xff] %v681_v16  ;;  %729 = vst [vmem:[%s1279_s3 + $0xd8] sm:$0xff] %v697_v17  ;;  %v839_v18 = vpop.f32.mrb[24].mxu0  ;;  %v887_v19 = vpop.f32.mrb[24].mxu1 }
 0x126   :  { %v840_v20 = vpop.f32.mrb[25].mxu0  ;;  %v888_v21 = vpop.f32.mrb[25].mxu1 }
 0x127   :  { %v841_v22 = vadd.f32 %v840_v20, %v839_v18  ;;  %v889_v23 = vadd.f32 %v888_v21, %v887_v19  ;;  %v842_v24 = vpop.f32.mrb[26].mxu0  ;;  %v890_v25 = vpop.f32.mrb[26].mxu1 }
 0x128   :  { %v843_v26 = vpop.f32.mrb[27].mxu0  ;;  %v891_v27 = vpop.f32.mrb[27].mxu1 }
 0x129   :  { %v682_v28 = vadd.f32 %v841_v22, %v1146_v51  ;;  %v698_v29 = vadd.f32 %v889_v23, %v1146_v51  ;;  %v844_v30 = vadd.f32 %v843_v26, %v842_v24  ;;  %v892_v31 = vadd.f32 %v891_v27, %v890_v25 }
 0x12b   :  { %714 = vst [vmem:[%s1279_s3 + $0x60] sm:$0xff] %v682_v28  ;;  %730 = vst [vmem:[%s1279_s3 + $0xe0] sm:$0xff] %v698_v29  ;;  %v683_v32 = vadd.f32 %v844_v30, %v1146_v51  ;;  %v699_v33 = vadd.f32 %v892_v31, %v1146_v51 }
 0x12d   :  { %715 = vst [vmem:[%s1279_s3 + $0x68] sm:$0xff] %v683_v32  ;;  %731 = vst [vmem:[%s1279_s3 + $0xe8] sm:$0xff] %v699_v33  ;;  %v845_v34 = vpop.f32.mrb[28].mxu0  ;;  %v893_v35 = vpop.f32.mrb[28].mxu1 }
 0x12e   :  { %v846_v36 = vpop.f32.mrb[29].mxu0  ;;  %v894_v37 = vpop.f32.mrb[29].mxu1 }
 0x12f   :  { %v847_v38 = vadd.f32 %v846_v36, %v845_v34  ;;  %v895_v39 = vadd.f32 %v894_v37, %v893_v35  ;;  %v848_v40 = vpop.f32.mrb[30].mxu0  ;;  %v896_v41 = vpop.f32.mrb[30].mxu1 }
 0x130   :  { %v849_v42 = vpop.f32.mrb[31].mxu0  ;;  %v897_v43 = vpop.f32.mrb[31].mxu1 }
 0x131   :  { %v684_v44 = vadd.f32 %v847_v38, %v1146_v51  ;;  %v700_v45 = vadd.f32 %v895_v39, %v1146_v51  ;;  %v850_v46 = vadd.f32 %v849_v42, %v848_v40  ;;  %v898_v47 = vadd.f32 %v897_v43, %v896_v41 }
 0x133   :  { %716 = vst [vmem:[%s1279_s3 + $0x70] sm:$0xff] %v684_v44  ;;  %732 = vst [vmem:[%s1279_s3 + $0xf0] sm:$0xff] %v700_v45  ;;  %v685_v48 = vadd.f32 %v850_v46, %v1146_v51  ;;  %v701_v49 = vadd.f32 %v898_v47, %v1146_v51 }
 0x135   :  { %717 = vst [vmem:[%s1279_s3 + $0x78] sm:$0xff] %v685_v48  ;;  %733 = vst [vmem:[%s1279_s3 + $0xf8] sm:$0xff] %v701_v49 }

// kernel: gcn_forward.5
= control target key start
LH: loop header
LB: loop body
LE: loop exit
PB: predicated region body
PF: predicated region fallthrough
CT: control target
= control target key end

     0   :  { %s1547_s1 = inlined_call_operand.vmem [shape: bf16[256,128], index: 1, kind: input, shape index: {}]   ;;  %s1548_s0 = inlined_call_operand.vmem [shape: bf16[256,256], index: 0, kind: input, shape index: {}]   ;;  %s1549_s2 = inlined_call_operand.vmem [shape: f32[1,128], index: 2, kind: input, shape index: {}]   ;;  %s1550_s3 = inlined_call_operand.vmem [shape: bf16[256,128], index: 3, kind: output, shape index: {}]  }
   0x1   :  { %v1234_v0 = vld [vmem:[%s1547_s1 + $0x40] sm:$0xff]   ;;  %v1236_v2 = vld [vmem:[%s1547_s1 + $0x48] sm:$0xff]   ;;  %v1238_v4 = vld [vmem:[%s1547_s1 + $0x50] sm:$0xff]  }
   0x2   :  { %v1235_v1 = vld [vmem:[%s1547_s1] sm:$0xff]   ;;  %1106 = vmatprep.subr.bf16.mxu0 %v1234_v0  ;;  %1218 = vmatprep.subr.bf16.mxu1 %v1234_v0  ;;  %v1237_v3 = vld [vmem:[%s1547_s1 + $0x8] sm:$0xff]   ;;  %v1239_v5 = vld [vmem:[%s1547_s1 + $0x10] sm:$0xff]  }
   0x3   :  { %1107 = vmatpush3.bf16.msra.mxu0 %v1235_v1  ;;  %1226 = vmatpush3.bf16.msra.mxu1 %v1235_v1  ;;  %v1240_v6 = vld [vmem:[%s1547_s1 + $0x58] sm:$0xff]   ;;  %v1242_v8 = vld [vmem:[%s1547_s1 + $0x60] sm:$0xff]   ;;  %v1244_v10 = vld [vmem:[%s1547_s1 + $0x68] sm:$0xff]  }
   0x4   :  { %1108 = vmatprep.subr.bf16.mxu0 %v1236_v2  ;;  %1219 = vmatprep.subr.bf16.mxu1 %v1236_v2  ;;  %v1241_v7 = vld [vmem:[%s1547_s1 + $0x18] sm:$0xff]   ;;  %v1243_v9 = vld [vmem:[%s1547_s1 + $0x20] sm:$0xff]   ;;  %v1245_v13 = vld [vmem:[%s1547_s1 + $0x28] sm:$0xff]  }
   0x5   :  { %v1252_v11 = vld [vmem:[%s1548_s0 + $0x4] ss:$8 sps:$4 sm:$0xff]   ;;  %v1246_v14 = vld [vmem:[%s1547_s1 + $0x70] sm:$0xff]   ;;  %v1248_v16 = vld [vmem:[%s1547_s1 + $0x78] sm:$0xff]  }
   0x6   :  { %v1255_v12 = vld [vmem:[%s1548_s0 + $0x84] ss:$8 sps:$4 sm:$0xff]   ;;  %435 = vmatprep.mubr.bf16.mxu0 %v1252_v11  ;;  %v1247_v15 = vld [vmem:[%s1547_s1 + $0x30] sm:$0xff]   ;;  %v1249_v17 = vld [vmem:[%s1547_s1 + $0x38] sm:$0xff]  }
   0x7   :  { %1109 = vmatpush3.bf16.msra.mxu0 %v1237_v3  ;;  %1227 = vmatpush3.bf16.msra.mxu1 %v1237_v3  ;;  %v1250_v18 = vld [vmem:[%s1548_s0] ss:$8 sps:$4 sm:$0xff]   ;;  %v1256_v20 = vld [vmem:[%s1548_s0 + $0x14] ss:$8 sps:$4 sm:$0xff]   ;;  %v1260_v22 = vld [vmem:[%s1548_s0 + $0x10] ss:$8 sps:$4 sm:$0xff]  }
   0x8   :  { %1110 = vmatprep.subr.bf16.mxu0 %v1238_v4  ;;  %1220 = vmatprep.subr.bf16.mxu1 %v1238_v4  ;;  %v1253_v19 = vld [vmem:[%s1548_s0 + $0x80] ss:$8 sps:$4 sm:$0xff]   ;;  %v1258_v21 = vld [vmem:[%s1548_s0 + $0x94] ss:$8 sps:$4 sm:$0xff]   ;;  %v1261_v23 = vld [vmem:[%s1548_s0 + $0x90] ss:$8 sps:$4 sm:$0xff]  }
   0x9   :  { %499 = vmatprep.mubr.bf16.mxu1 %v1255_v12  ;;  %v1262_v24 = vld [vmem:[%s1548_s0 + $0x24] ss:$8 sps:$4 sm:$0xff]   ;;  %v1266_v26 = vld [vmem:[%s1548_s0 + $0x20] ss:$8 sps:$4 sm:$0xff]   ;;  %v1268_v28 = vld [vmem:[%s1548_s0 + $0x34] ss:$8 sps:$4 sm:$0xff]  }
   0xa   :  { %v1264_v25 = vld [vmem:[%s1548_s0 + $0xa4] ss:$8 sps:$4 sm:$0xff]   ;;  %v1267_v27 = vld [vmem:[%s1548_s0 + $0xa0] ss:$8 sps:$4 sm:$0xff]   ;;  %v1270_v29 = vld [vmem:[%s1548_s0 + $0xb4] ss:$8 sps:$4 sm:$0xff]  }
   0xb   :  { %1111 = vmatpush3.bf16.msra.mxu0 %v1239_v5  ;;  %1228 = vmatpush3.bf16.msra.mxu1 %v1239_v5  ;;  %v1272_v30 = vld [vmem:[%s1548_s0 + $0x30] ss:$8 sps:$4 sm:$0xff]   ;;  %v1274_v32 = vld [vmem:[%s1548_s0 + $0x44] ss:$8 sps:$4 sm:$0xff]   ;;  %v1278_v34 = vld [vmem:[%s1548_s0 + $0x40] ss:$8 sps:$4 sm:$0xff]  }
   0xc   :  { %1112 = vmatprep.subr.bf16.mxu0 %v1240_v6  ;;  %1221 = vmatprep.subr.bf16.mxu1 %v1240_v6  ;;  %v1273_v31 = vld [vmem:[%s1548_s0 + $0xb0] ss:$8 sps:$4 sm:$0xff]   ;;  %v1276_v33 = vld [vmem:[%s1548_s0 + $0xc4] ss:$8 sps:$4 sm:$0xff]   ;;  %v1279_v35 = vld [vmem:[%s1548_s0 + $0xc0] ss:$8 sps:$4 sm:$0xff]  }
   0xd   :  { %v1280_v36 = vld [vmem:[%s1548_s0 + $0x54] ss:$8 sps:$4 sm:$0xff]   ;;  %v1284_v38 = vld [vmem:[%s1548_s0 + $0x50] ss:$8 sps:$4 sm:$0xff]   ;;  %v1286_v40 = vld [vmem:[%s1548_s0 + $0x64] ss:$8 sps:$4 sm:$0xff]  }
   0xe   :  { %v1282_v37 = vld [vmem:[%s1548_s0 + $0xd4] ss:$8 sps:$4 sm:$0xff]   ;;  %v1285_v39 = vld [vmem:[%s1548_s0 + $0xd0] ss:$8 sps:$4 sm:$0xff]   ;;  %v1288_v41 = vld [vmem:[%s1548_s0 + $0xe4] ss:$8 sps:$4 sm:$0xff]  }
   0xf   :  { %1113 = vmatpush3.bf16.msra.mxu0 %v1241_v7  ;;  %1229 = vmatpush3.bf16.msra.mxu1 %v1241_v7  ;;  %v1290_v42 = vld [vmem:[%s1548_s0 + $0x60] ss:$8 sps:$4 sm:$0xff]   ;;  %v1292_v44 = vld [vmem:[%s1548_s0 + $0x74] ss:$8 sps:$4 sm:$0xff]   ;;  %v1296_v46 = vld [vmem:[%s1548_s0 + $0x70] ss:$8 sps:$4 sm:$0xff]  }
  0x10   :  { %1114 = vmatprep.subr.bf16.mxu0 %v1242_v8  ;;  %1222 = vmatprep.subr.bf16.mxu1 %v1242_v8  ;;  %v1291_v43 = vld [vmem:[%s1548_s0 + $0xe0] ss:$8 sps:$4 sm:$0xff]   ;;  %v1294_v45 = vld [vmem:[%s1548_s0 + $0xf4] ss:$8 sps:$4 sm:$0xff]   ;;  %v1297_v47 = vld [vmem:[%s1548_s0 + $0xf0] ss:$8 sps:$4 sm:$0xff]  }
  0x11   :  { %v1465_v51 = vld [vmem:[%s1549_s2] ss:$0 sm:$0xff] }
  0x13   :  { %1115 = vmatpush3.bf16.msra.mxu0 %v1243_v9  ;;  %1230 = vmatpush3.bf16.msra.mxu1 %v1243_v9 }
  0x14   :  { %1116 = vmatprep.subr.bf16.mxu0 %v1244_v10  ;;  %1223 = vmatprep.subr.bf16.mxu1 %v1244_v10 }
  0x17   :  { %1117 = vmatpush3.bf16.msra.mxu0 %v1245_v13  ;;  %1231 = vmatpush3.bf16.msra.mxu1 %v1245_v13 }
  0x18   :  { %1118 = vmatprep.subr.bf16.mxu0 %v1246_v14  ;;  %1224 = vmatprep.subr.bf16.mxu1 %v1246_v14 }
  0x1b   :  { %1119 = vmatpush3.bf16.msra.mxu0 %v1247_v15  ;;  %1232 = vmatpush3.bf16.msra.mxu1 %v1247_v15 }
  0x1c   :  { %1120 = vmatprep.subr.bf16.mxu0 %v1248_v16  ;;  %1225 = vmatprep.subr.bf16.mxu1 %v1248_v16 }
  0x1f   :  { %1121 = vmatpush3.bf16.msra.mxu0 %v1249_v17  ;;  %1233 = vmatpush3.bf16.msra.mxu1 %v1249_v17 }
  0x22   :  { %436 = vmatmul.mubr.bf16.vlgmr.msra.gmra.mrb[0].mxu0 %v1250_v18  ;;  %500 = vmatmul.mubr.bf16.vlgmr.msra.gmra.mrb[0].mxu1 %v1253_v19 }
  0x23   :  { %443 = vmatprep.mubr.bf16.mxu0 %v1256_v20  ;;  %507 = vmatprep.mubr.bf16.mxu1 %v1258_v21 }
  0x2a   :  { %444 = vmatmul.mubr.bf16.gmra.mrb[4].mxu0 %v1260_v22  ;;  %508 = vmatmul.mubr.bf16.gmra.mrb[4].mxu1 %v1261_v23 }
  0x2b   :  { %451 = vmatprep.mubr.bf16.mxu0 %v1262_v24  ;;  %515 = vmatprep.mubr.bf16.mxu1 %v1264_v25 }
  0x32   :  { %452 = vmatmul.mubr.bf16.gmra.mrb[8].mxu0 %v1266_v26  ;;  %516 = vmatmul.mubr.bf16.gmra.mrb[8].mxu1 %v1267_v27 }
  0x33   :  { %459 = vmatprep.mubr.bf16.mxu0 %v1268_v28  ;;  %523 = vmatprep.mubr.bf16.mxu1 %v1270_v29 }
  0x3a   :  { %460 = vmatmul.mubr.bf16.gmra.mrb[12].mxu0 %v1272_v30  ;;  %524 = vmatmul.mubr.bf16.gmra.mrb[12].mxu1 %v1273_v31 }
  0x3b   :  { %467 = vmatprep.mubr.bf16.mxu0 %v1274_v32  ;;  %531 = vmatprep.mubr.bf16.mxu1 %v1276_v33 }
  0x42   :  { %468 = vmatmul.mubr.bf16.gmra.mrb[16].mxu0 %v1278_v34  ;;  %532 = vmatmul.mubr.bf16.gmra.mrb[16].mxu1 %v1279_v35 }
  0x43   :  { %475 = vmatprep.mubr.bf16.mxu0 %v1280_v36  ;;  %539 = vmatprep.mubr.bf16.mxu1 %v1282_v37 }
  0x4a   :  { %476 = vmatmul.mubr.bf16.gmra.mrb[20].mxu0 %v1284_v38  ;;  %540 = vmatmul.mubr.bf16.gmra.mrb[20].mxu1 %v1285_v39 }
  0x4b   :  { %483 = vmatprep.mubr.bf16.mxu0 %v1286_v40  ;;  %547 = vmatprep.mubr.bf16.mxu1 %v1288_v41 }
  0x52   :  { %484 = vmatmul.mubr.bf16.gmra.mrb[24].mxu0 %v1290_v42  ;;  %548 = vmatmul.mubr.bf16.gmra.mrb[24].mxu1 %v1291_v43 }
  0x53   :  { %491 = vmatprep.mubr.bf16.mxu0 %v1292_v44  ;;  %555 = vmatprep.mubr.bf16.mxu1 %v1294_v45 }
  0x5a   :  { %492 = vmatmul.mubr.bf16.gmra.mrb[28].mxu0 %v1296_v46  ;;  %556 = vmatmul.mubr.bf16.gmra.mrb[28].mxu1 %v1297_v47 }
  0xf5   :  { %v1122_v48 = vpop.f32.mrb[0].mxu0  ;;  %v1170_v49 = vpop.f32.mrb[0].mxu1 }
  0xf6   :  { %v1123_v50 = vpop.f32.mrb[1].mxu0  ;;  %v1171_v52 = vpop.f32.mrb[1].mxu1 }
  0xf7   :  { %v1124_v53 = vadd.f32 %v1123_v50, %v1122_v48  ;;  %v1172_v54 = vadd.f32 %v1171_v52, %v1170_v49  ;;  %v1125_v55 = vpop.f32.mrb[2].mxu0  ;;  %v1173_v56 = vpop.f32.mrb[2].mxu1 }
  0xf8   :  { %v1126_v57 = vpop.f32.mrb[3].mxu0  ;;  %v1174_v58 = vpop.f32.mrb[3].mxu1 }
  0xf9   :  { %v670_v59 = vadd.f32 %v1124_v53, %v1465_v51  ;;  %v686_v60 = vadd.f32 %v1172_v54, %v1465_v51  ;;  %v1127_v61 = vadd.f32 %v1126_v57, %v1125_v55  ;;  %v1175_v62 = vadd.f32 %v1174_v58, %v1173_v56 }
  0xfb   :  { %v671_v63 = vadd.f32 %v1127_v61, %v1465_v51  ;;  %v687_v0 = vadd.f32 %v1175_v62, %v1465_v51  ;;  %v702_v1 = vmax.f32 %v670_v59, 0.0  ;;  %v718_v2 = vmax.f32 %v686_v60, 0.0 }
  0xfd   :  { %v703_v3 = vmax.f32 %v671_v63, 0.0  ;;  %v719_v4 = vmax.f32 %v687_v0, 0.0  ;;  %v1128_v5 = vpop.f32.mrb[4].mxu0  ;;  %v1176_v6 = vpop.f32.mrb[4].mxu1 }
  0xfe   :  { %v1129_v7 = vpop.f32.mrb[5].mxu0  ;;  %v1177_v8 = vpop.f32.mrb[5].mxu1 }
  0xff   :  { %v1014_v9 = vpack.c.bf16 %v703_v3, %v702_v1  ;;  %v1054_v10 = vpack.c.bf16 %v719_v4, %v718_v2  ;;  %v1130_v11 = vadd.f32 %v1129_v7, %v1128_v5  ;;  %v1178_v12 = vadd.f32 %v1177_v8, %v1176_v6  ;;  %v1131_v13 = vpop.f32.mrb[6].mxu0  ;;  %v1179_v14 = vpop.f32.mrb[6].mxu1 }
 0x100   :  { %v1132_v15 = vpop.f32.mrb[7].mxu0  ;;  %v1180_v16 = vpop.f32.mrb[7].mxu1 }
 0x101   :  { %1015 = vst [vmem:[%s1550_s3] sm:$0xff] %v1014_v9   ;;  %1098 = vst [vmem:[%s1550_s3 + $0x40] sm:$0xff] %v1054_v10   ;;  %v672_v17 = vadd.f32 %v1130_v11, %v1465_v51  ;;  %v688_v18 = vadd.f32 %v1178_v12, %v1465_v51  ;;  %v1133_v19 = vadd.f32 %v1132_v15, %v1131_v13 }
 0x102   :  { %v1181_v20 = vadd.f32 %v1180_v16, %v1179_v14 }
 0x103   :  { %v673_v21 = vadd.f32 %v1133_v19, %v1465_v51  ;;  %v704_v23 = vmax.f32 %v672_v17, 0.0  ;;  %v720_v24 = vmax.f32 %v688_v18, 0.0 }
 0x104   :  { %v689_v22 = vadd.f32 %v1181_v20, %v1465_v51 }
 0x105   :  { %v705_v25 = vmax.f32 %v673_v21, 0.0  ;;  %v1134_v27 = vpop.f32.mrb[8].mxu0  ;;  %v1182_v28 = vpop.f32.mrb[8].mxu1 }
 0x106   :  { %v721_v26 = vmax.f32 %v689_v22, 0.0  ;;  %v1135_v29 = vpop.f32.mrb[9].mxu0  ;;  %v1183_v30 = vpop.f32.mrb[9].mxu1 }
 0x107   :  { %v1019_v31 = vpack.c.bf16 %v705_v25, %v704_v23  ;;  %v1136_v33 = vadd.f32 %v1135_v29, %v1134_v27  ;;  %v1184_v34 = vadd.f32 %v1183_v30, %v1182_v28  ;;  %v1137_v35 = vpop.f32.mrb[10].mxu0  ;;  %v1185_v36 = vpop.f32.mrb[10].mxu1 }
 0x108   :  { %v1059_v32 = vpack.c.bf16 %v721_v26, %v720_v24  ;;  %v1138_v37 = vpop.f32.mrb[11].mxu0  ;;  %v1186_v38 = vpop.f32.mrb[11].mxu1 }
 0x109   :  { %1091 = vst [vmem:[%s1550_s3 + $0x8] sm:$0xff] %v1019_v31   ;;  %v674_v39 = vadd.f32 %v1136_v33, %v1465_v51  ;;  %v690_v40 = vadd.f32 %v1184_v34, %v1465_v51  ;;  %v1139_v41 = vadd.f32 %v1138_v37, %v1137_v35  ;;  %v1187_v42 = vadd.f32 %v1186_v38, %v1185_v36 }
 0x10a   :  { %1099 = vst [vmem:[%s1550_s3 + $0x48] sm:$0xff] %v1059_v32  }
 0x10b   :  { %v675_v43 = vadd.f32 %v1139_v41, %v1465_v51  ;;  %v691_v44 = vadd.f32 %v1187_v42, %v1465_v51  ;;  %v706_v45 = vmax.f32 %v674_v39, 0.0  ;;  %v722_v46 = vmax.f32 %v690_v40, 0.0 }
 0x10d   :  { %v707_v47 = vmax.f32 %v675_v43, 0.0  ;;  %v723_v48 = vmax.f32 %v691_v44, 0.0  ;;  %v1140_v49 = vpop.f32.mrb[12].mxu0  ;;  %v1188_v50 = vpop.f32.mrb[12].mxu1 }
 0x10e   :  { %v1141_v52 = vpop.f32.mrb[13].mxu0  ;;  %v1189_v53 = vpop.f32.mrb[13].mxu1 }
 0x10f   :  { %v1024_v54 = vpack.c.bf16 %v707_v47, %v706_v45  ;;  %v1064_v55 = vpack.c.bf16 %v723_v48, %v722_v46  ;;  %v1142_v56 = vadd.f32 %v1141_v52, %v1140_v49  ;;  %v1190_v57 = vadd.f32 %v1189_v53, %v1188_v50  ;;  %v1143_v58 = vpop.f32.mrb[14].mxu0  ;;  %v1191_v59 = vpop.f32.mrb[14].mxu1 }
 0x110   :  { %v1144_v60 = vpop.f32.mrb[15].mxu0  ;;  %v1192_v61 = vpop.f32.mrb[15].mxu1 }
 0x111   :  { %1092 = vst [vmem:[%s1550_s3 + $0x10] sm:$0xff] %v1024_v54   ;;  %1100 = vst [vmem:[%s1550_s3 + $0x50] sm:$0xff] %v1064_v55   ;;  %v676_v62 = vadd.f32 %v1142_v56, %v1465_v51  ;;  %v692_v63 = vadd.f32 %v1190_v57, %v1465_v51  ;;  %v1145_v0 = vadd.f32 %v1144_v60, %v1143_v58 }
 0x112   :  { %v1193_v1 = vadd.f32 %v1192_v61, %v1191_v59 }
 0x113   :  { %v677_v2 = vadd.f32 %v1145_v0, %v1465_v51  ;;  %v708_v4 = vmax.f32 %v676_v62, 0.0  ;;  %v724_v5 = vmax.f32 %v692_v63, 0.0 }
 0x114   :  { %v693_v3 = vadd.f32 %v1193_v1, %v1465_v51 }
 0x115   :  { %v709_v6 = vmax.f32 %v677_v2, 0.0  ;;  %v1146_v8 = vpop.f32.mrb[16].mxu0  ;;  %v1194_v9 = vpop.f32.mrb[16].mxu1 }
 0x116   :  { %v725_v7 = vmax.f32 %v693_v3, 0.0  ;;  %v1147_v10 = vpop.f32.mrb[17].mxu0  ;;  %v1195_v11 = vpop.f32.mrb[17].mxu1 }
 0x117   :  { %v1029_v12 = vpack.c.bf16 %v709_v6, %v708_v4  ;;  %v1148_v14 = vadd.f32 %v1147_v10, %v1146_v8  ;;  %v1196_v15 = vadd.f32 %v1195_v11, %v1194_v9  ;;  %v1149_v16 = vpop.f32.mrb[18].mxu0  ;;  %v1197_v17 = vpop.f32.mrb[18].mxu1 }
 0x118   :  { %v1069_v13 = vpack.c.bf16 %v725_v7, %v724_v5  ;;  %v1150_v18 = vpop.f32.mrb[19].mxu0  ;;  %v1198_v19 = vpop.f32.mrb[19].mxu1 }
 0x119   :  { %1093 = vst [vmem:[%s1550_s3 + $0x18] sm:$0xff] %v1029_v12   ;;  %v678_v20 = vadd.f32 %v1148_v14, %v1465_v51  ;;  %v694_v21 = vadd.f32 %v1196_v15, %v1465_v51  ;;  %v1151_v22 = vadd.f32 %v1150_v18, %v1149_v16  ;;  %v1199_v23 = vadd.f32 %v1198_v19, %v1197_v17 }
 0x11a   :  { %1101 = vst [vmem:[%s1550_s3 + $0x58] sm:$0xff] %v1069_v13  }
 0x11b   :  { %v679_v24 = vadd.f32 %v1151_v22, %v1465_v51  ;;  %v695_v25 = vadd.f32 %v1199_v23, %v1465_v51  ;;  %v710_v26 = vmax.f32 %v678_v20, 0.0  ;;  %v726_v27 = vmax.f32 %v694_v21, 0.0 }
 0x11d   :  { %v711_v28 = vmax.f32 %v679_v24, 0.0  ;;  %v727_v29 = vmax.f32 %v695_v25, 0.0  ;;  %v1152_v30 = vpop.f32.mrb[20].mxu0  ;;  %v1200_v31 = vpop.f32.mrb[20].mxu1 }
 0x11e   :  { %v1153_v32 = vpop.f32.mrb[21].mxu0  ;;  %v1201_v33 = vpop.f32.mrb[21].mxu1 }
 0x11f   :  { %v1034_v34 = vpack.c.bf16 %v711_v28, %v710_v26  ;;  %v1074_v35 = vpack.c.bf16 %v727_v29, %v726_v27  ;;  %v1154_v36 = vadd.f32 %v1153_v32, %v1152_v30  ;;  %v1202_v37 = vadd.f32 %v1201_v33, %v1200_v31  ;;  %v1155_v38 = vpop.f32.mrb[22].mxu0  ;;  %v1203_v39 = vpop.f32.mrb[22].mxu1 }
 0x120   :  { %v1156_v40 = vpop.f32.mrb[23].mxu0  ;;  %v1204_v41 = vpop.f32.mrb[23].mxu1 }
 0x121   :  { %1094 = vst [vmem:[%s1550_s3 + $0x20] sm:$0xff] %v1034_v34   ;;  %1102 = vst [vmem:[%s1550_s3 + $0x60] sm:$0xff] %v1074_v35   ;;  %v680_v42 = vadd.f32 %v1154_v36, %v1465_v51  ;;  %v696_v43 = vadd.f32 %v1202_v37, %v1465_v51  ;;  %v1157_v44 = vadd.f32 %v1156_v40, %v1155_v38 }
 0x122   :  { %v1205_v45 = vadd.f32 %v1204_v41, %v1203_v39 }
 0x123   :  { %v681_v46 = vadd.f32 %v1157_v44, %v1465_v51  ;;  %v712_v48 = vmax.f32 %v680_v42, 0.0  ;;  %v728_v49 = vmax.f32 %v696_v43, 0.0 }
 0x124   :  { %v697_v47 = vadd.f32 %v1205_v45, %v1465_v51 }
 0x125   :  { %v713_v50 = vmax.f32 %v681_v46, 0.0  ;;  %v1158_v53 = vpop.f32.mrb[24].mxu0  ;;  %v1206_v54 = vpop.f32.mrb[24].mxu1 }
 0x126   :  { %v729_v52 = vmax.f32 %v697_v47, 0.0  ;;  %v1159_v55 = vpop.f32.mrb[25].mxu0  ;;  %v1207_v56 = vpop.f32.mrb[25].mxu1 }
 0x127   :  { %v1039_v57 = vpack.c.bf16 %v713_v50, %v712_v48  ;;  %v1160_v59 = vadd.f32 %v1159_v55, %v1158_v53  ;;  %v1208_v60 = vadd.f32 %v1207_v56, %v1206_v54  ;;  %v1161_v61 = vpop.f32.mrb[26].mxu0  ;;  %v1209_v62 = vpop.f32.mrb[26].mxu1 }
 0x128   :  { %v1079_v58 = vpack.c.bf16 %v729_v52, %v728_v49  ;;  %v1162_v63 = vpop.f32.mrb[27].mxu0  ;;  %v1210_v0 = vpop.f32.mrb[27].mxu1 }
 0x129   :  { %1095 = vst [vmem:[%s1550_s3 + $0x28] sm:$0xff] %v1039_v57   ;;  %v682_v1 = vadd.f32 %v1160_v59, %v1465_v51  ;;  %v698_v2 = vadd.f32 %v1208_v60, %v1465_v51  ;;  %v1163_v3 = vadd.f32 %v1162_v63, %v1161_v61  ;;  %v1211_v4 = vadd.f32 %v1210_v0, %v1209_v62 }
 0x12a   :  { %1103 = vst [vmem:[%s1550_s3 + $0x68] sm:$0xff] %v1079_v58  }
 0x12b   :  { %v683_v5 = vadd.f32 %v1163_v3, %v1465_v51  ;;  %v699_v6 = vadd.f32 %v1211_v4, %v1465_v51  ;;  %v714_v7 = vmax.f32 %v682_v1, 0.0  ;;  %v730_v8 = vmax.f32 %v698_v2, 0.0 }
 0x12d   :  { %v715_v9 = vmax.f32 %v683_v5, 0.0  ;;  %v731_v10 = vmax.f32 %v699_v6, 0.0  ;;  %v1164_v11 = vpop.f32.mrb[28].mxu0  ;;  %v1212_v12 = vpop.f32.mrb[28].mxu1 }
 0x12e   :  { %v1165_v13 = vpop.f32.mrb[29].mxu0  ;;  %v1213_v14 = vpop.f32.mrb[29].mxu1 }
 0x12f   :  { %v1044_v15 = vpack.c.bf16 %v715_v9, %v714_v7  ;;  %v1084_v16 = vpack.c.bf16 %v731_v10, %v730_v8  ;;  %v1166_v17 = vadd.f32 %v1165_v13, %v1164_v11  ;;  %v1214_v18 = vadd.f32 %v1213_v14, %v1212_v12  ;;  %v1167_v19 = vpop.f32.mrb[30].mxu0  ;;  %v1215_v20 = vpop.f32.mrb[30].mxu1 }
 0x130   :  { %v1168_v21 = vpop.f32.mrb[31].mxu0  ;;  %v1216_v22 = vpop.f32.mrb[31].mxu1 }
 0x131   :  { %1096 = vst [vmem:[%s1550_s3 + $0x30] sm:$0xff] %v1044_v15   ;;  %1104 = vst [vmem:[%s1550_s3 + $0x70] sm:$0xff] %v1084_v16   ;;  %v684_v23 = vadd.f32 %v1166_v17, %v1465_v51  ;;  %v700_v24 = vadd.f32 %v1214_v18, %v1465_v51  ;;  %v1169_v25 = vadd.f32 %v1168_v21, %v1167_v19 }
 0x132   :  { %v1217_v26 = vadd.f32 %v1216_v22, %v1215_v20 }
 0x133   :  { %v685_v27 = vadd.f32 %v1169_v25, %v1465_v51  ;;  %v716_v29 = vmax.f32 %v684_v23, 0.0  ;;  %v732_v30 = vmax.f32 %v700_v24, 0.0 }
 0x134   :  { %v701_v28 = vadd.f32 %v1217_v26, %v1465_v51 }
 0x135   :  { %v717_v31 = vmax.f32 %v685_v27, 0.0 }
 0x136   :  { %v733_v32 = vmax.f32 %v701_v28, 0.0 }
 0x137   :  { %v1049_v33 = vpack.c.bf16 %v717_v31, %v716_v29 }
 0x138   :  { %v1089_v34 = vpack.c.bf16 %v733_v32, %v732_v30 }
 0x139   :  { %1097 = vst [vmem:[%s1550_s3 + $0x38] sm:$0xff] %v1049_v33  }
 0x13a   :  { %1105 = vst [vmem:[%s1550_s3 + $0x78] sm:$0xff] %v1089_v34  }

</bundles_post_ra>
